<compile_context>
chip_gen: v7x
topology: tpu7x:2x2x1
jax: 0.10.0
libtpu: 0.0.40
codegen_flags: <defaults>
</compile_context>

<pallas_src>
import jax
import jax.numpy as jnp
from jax.experimental import pallas as pl
from jax.experimental.pallas import tpu as pltpu


def _patch_unembed_kernel(x_ref, o_ref):
    # x block: (1, TL, TC)  ->  o block: (1, TC, TL).  Pure XLU transpose,
    # hidden under the HBM DMAs; no bitcast-packing tricks needed unless a
    # profile shows sub-32-bit inputs falling off the HBM roofline.
    o_ref[0] = x_ref[0].T


def _round_up(x, m):
    return ((x + m - 1) // m) * m


def _round_down(x, m):
    return (x // m) * m


def _vmem_capacity_bytes():
    # Physical VMEM per TensorCore (128 MiB on v5e/v6e, 64 MiB on v7x).
    try:
        cap = getattr(pltpu.get_tpu_info(), "vmem_capacity_bytes", None)
        if cap:
            return int(cap)
    except Exception:
        pass
    return 64 * 1024 * 1024  # conservative default (v7x per-core VMEM)


def _choose_tiles(L, C, itemsize):
    """Pick (TL, TC) and vmem_limit_bytes for the double-buffered pipeline."""
    # Channel tile: decouple TL from C only when C is large.
    TC = 256 if C >= 256 else C

    cap = _vmem_capacity_bytes()
    # Double-buffered (input + output) tile footprint must stay well inside
    # physical VMEM on every generation.
    budget = min(48 * 1024 * 1024, cap // 2)

    # Padded VMEM bytes per token row, double-buffered:
    #   input  tile (TL, TC): lane dim TC pads to 128
    #   output tile (TC, TL): sublane dim TC pads to 8, lane dim TL
    per_token = 2 * itemsize * (_round_up(TC, 128) + _round_up(TC, 8))

    if L < 128:
        TL = L  # full-extent block (always legal)
    else:
        tl_budget = _round_down(max(128, budget // per_token), 128)
        TL = max(128, min(8192, _round_down(L, 128), tl_budget))

    footprint = 2 * itemsize * (
        _round_up(TL, 8) * _round_up(TC, 128)        # input tile
        + _round_up(TC, 8) * _round_up(TL, 128))     # output tile
    vmem_limit = max(16 * 1024 * 1024, footprint + footprint // 4 + (2 << 20))
    vmem_limit = min(vmem_limit, cap - (4 << 20))
    return TL, TC, int(vmem_limit)


def patch_unembed(x, x_size):
    """x: (B, L, C) with L = H*W  ->  (B, C, H, W)."""
    B, L, C = x.shape
    H, W = x_size
    assert L == H * W, (L, H, W)

    itemsize = jnp.dtype(x.dtype).itemsize
    TL, TC, vmem_limit = _choose_tiles(L, C, itemsize)

    # Long token axis outermost -> megacore-sharded on v7x even for B == 1.
    grid = (pl.cdiv(L, TL), B, pl.cdiv(C, TC))

    out = pl.pallas_call(
        _patch_unembed_kernel,
        out_shape=jax.ShapeDtypeStruct((B, C, L), x.dtype),
        grid=grid,
        in_specs=[pl.BlockSpec((1, TL, TC), lambda l, b, c: (b, l, c))],
        out_specs=pl.BlockSpec((1, TC, TL), lambda l, b, c: (b, c, l)),
        compiler_params=pltpu.CompilerParams(
            dimension_semantics=("parallel", "parallel", "parallel"),
            vmem_limit_bytes=vmem_limit),
    )(x)
    # Splitting the minor-most L axis into (H, W) is a metadata-only reshape.
    return out.reshape(B, C, H, W)


def reference(x, x_size):
    B, L, C = x.shape
    H, W = x_size
    return jnp.transpose(x, (0, 2, 1)).reshape(B, C, H, W)


if __name__ == "__main__":
    key = jax.random.PRNGKey(0)
    cases = [
        (2, 16, 16, 32),   # embed_dim=32, 16x16 tokens (aligned path)
        (1, 15, 13, 96),   # ragged L -> masked tail tiles, default embed_dim
        (1, 8, 8, 320),    # C >= 256 -> channel-tiled path, full-extent L block
    ]
    for i, (B, H, W, C) in enumerate(cases):
        L = H * W
        key, sub = jax.random.split(key)
        x = jax.random.normal(sub, (B, L, C), jnp.float32)

        out = jax.block_until_ready(patch_unembed(x, (H, W)))
        ref = reference(x, (H, W))

        assert out.shape == (B, C, H, W), (i, out.shape)
        # Pure data movement -> must match bit-exactly.
        assert jnp.array_equal(out, ref), i

    print("KERNEL_OK")
</pallas_src>

<mosaic_0001>
module attributes {stable_mosaic.version = 11 : i64} {
  func.func @_patch_unembed_kernel(%arg0: i32, %arg1: i32, %arg2: i32, %arg3: memref<1x256x32xf32, #tpu.memory_space<vmem>>, %arg4: memref<1x32x256xf32, #tpu.memory_space<vmem>>) attributes {dimension_semantics = [#tpu.dimension_semantics<parallel>, #tpu.dimension_semantics<parallel>, #tpu.dimension_semantics<parallel>], iteration_bounds = array<i64: 1, 2, 1>, scalar_prefetch = 0 : i64, scratch_operands = 0 : i64, tpu.core_type = #tpu.core_type<tc>, window_params = [{transform_indices = @transform_0, window_bounds = array<i64: 1, 256, 32>}, {transform_indices = @transform_1, window_bounds = array<i64: 1, 32, 256>}]} {
    %c0 = arith.constant 0 : index
    %c0_0 = arith.constant 0 : index
    %c0_1 = arith.constant 0 : index
    %0 = vector.load %arg3[%c0, %c0_0, %c0_1] : memref<1x256x32xf32, #tpu.memory_space<vmem>>, vector<1x256x32xf32>
    %1 = vector.shape_cast %0 : vector<1x256x32xf32> to vector<256x32xf32>
    %2 = tpu.transpose %1, [1, 0] : vector<256x32xf32> -> vector<32x256xf32>
    %c0_2 = arith.constant 0 : index
    %c0_3 = arith.constant 0 : index
    %c0_4 = arith.constant 0 : index
    %3 = vector.load %arg4[%c0_2, %c0_3, %c0_4] : memref<1x32x256xf32, #tpu.memory_space<vmem>>, vector<1x32x256xf32>
    %4 = vector.shape_cast %3 : vector<1x32x256xf32> to vector<32x256xf32>
    %5 = vector.shape_cast %2 : vector<32x256xf32> to vector<1x32x256xf32>
    tpu.vector_store %arg4[%c0_2, %c0_3, %c0_4], %5 {strides = array<i32>} : memref<1x32x256xf32, #tpu.memory_space<vmem>>, vector<1x32x256xf32>,
    return
  }
  func.func @transform_0(%arg0: i32, %arg1: i32, %arg2: i32) -> (i32, i32, i32) {
    %c0_i32 = arith.constant 0 : i32
    return %arg1, %arg0, %arg2 : i32, i32, i32
  }
  func.func @transform_1(%arg0: i32, %arg1: i32, %arg2: i32) -> (i32, i32, i32) {
    %c0_i32 = arith.constant 0 : i32
    return %arg1, %arg2, %arg0 : i32, i32, i32
  }
}

</mosaic_0001>

<bundles_post_ra>
// kernel: tpu_custom_call.1
= control target key start
LH: loop header
LB: loop body
LE: loop exit
PB: predicated region body
PF: predicated region fallthrough
CT: control target
= control target key end

     0   :  { %6 = vsyncpa [#allocation3], 0  ;;  %s691_s0 = inlined_call_operand.vmem [shape: f32[2,256,32], index: 0, kind: input, shape index: {}]   ;;  %s692_s1 = inlined_call_operand.hbm [shape: f32[2,32,256], index: 1, kind: output, shape index: {}]  }
   0x1   :  { %8 = vsyncpa [#allocation3 + $0x1], 0  ;;  %s542_s6 = smov 0   ;;  %s544_s7 = smov 0  }
   0x2   :  { %s546_s8 = smov 0   ;;  %s548_s9 = smov 0  }
   0x3   :  { %s550_s10 = smov 0   ;;  %s552_s11 = smov 0  }
   0x4 LB: > { %s377_s12 = sadd.s32 4294967295, %s527_s11   ;;  %s378_s13 = sadd.s32 4294967294, %s527_s11   ;;  %s527_s11 = sphi %s552_s11, %s14_s11   ;;  %s523_s10 = sphi %s550_s10, %s699_s10   ;;  %s519_s9 = sphi %s548_s9, %s698_s9   ;;  %s515_s8 = sphi %s546_s8, %s697_s8   ;;  %s511_s7 = sphi %s544_s7, %s696_s7   ;;  %s507_s6 = sphi %s542_s6, %s695_s6  }
   0x5   : > { %s29_s14 = sadd.s32 1, %s523_s10  ;;  %s74_s15 = sadd.s32 1, %s515_s8 }
   0x6   : > { %p31_p0 = scmp.ge.s32.totalorder %s29_s14, 2  ;;  %p84_p1 = scmp.ne.s32.totalorder %s515_s8, %s511_s7 }
   0x7   : > { %p85_p2 = scmp.eq.s32.totalorder %s377_s12, 1  ;;  %p90_p3 = scmp.ne.s32.totalorder %s511_s7, %s507_s6 }
   0x8   : > { %s701_s14 = smov (%p31_p0, %s29_s14), 0  ;;  %p91_p5 = scmp.eq.s32.totalorder %s378_s13, 1 }
   0x9   : > { %p582_p4 = por %p85_p2, %p84_p1  ;;  %s67_s17 = ssub.s32 %s523_s10, %s701_s14 }
   0xa   : > { %p381_p6 = scmp.ge.s32.totalorder %s527_s11, 1  ;;  %p72_p7 = scmp.eq.s32.totalorder %s67_s17, 0 }
   0xb   : > { %p589_p8 = por %p91_p5, %p90_p3  ;;  %p125_p9 = scmp.lt.s32.totalorder %s527_s11, 3 }
   0xc   : > { %s595_s19 = scalar_select %p72_p7, %s515_s8, %s74_s15  }
   0xd   : > { %p126_p10 = pnand %p381_p6, %p125_p9 }
   0xe   : > { %p153_p11 = scmp.lt.s32.totalorder (!%p126_p10), %s519_s9, 1  ;;  %s149_s25 = sand.u32 (!%p126_p10), 1, %s511_s7  }
   0xf   : > { %129 = sbr.rel (%p126_p10) target bundleno = 184 (0xb8), region = 24  ;;  %s382_s26 = sshll.u32 (!%p126_p10), %s149_s25, 6 }
  0x10   : > { %s151_s27 = scalar_lea.vmem (!%p126_p10), [#allocation2], %s382_s26  ;;  %s391_s29 = sshll.u32 (!%p126_p10), %s519_s9, 10 }
  0x11   : > { %s290_s28 = sshll.u32 (!%p126_p10), %s151_s27, 4  ;;  %s643_s3 = scalar_lea.hbm (!%p126_p10), %s692_s1, %s391_s29  ;;  %s638_s28 = int_to_ptr.vmem [resolvable:$true] %s290_s28 }
  0x12   : > { %s645_s4 = scalar_lea.sflag (!%p126_p10), [#allocation3], %s149_s25  ;;  %s449_s5 = scalar_lea.vmem (!%p126_p10), %s638_s28, 1024 }
  0x13   : > { %p450_p12 = scmp.ne.s32.totalorder (!%p126_p10), %s638_s28, %s449_s5 }
  0x15   : > { %p451_p13 = pnand (!%p126_p10), %p450_p12, %p582_p4 }
  0x16   : > { %s154_s20 = scalar_select %p153_p11, %s519_s9, 1 }
  0x17   : > { %p452_p0 = pneg %p451_p13  ;;  %s529_s9 = smov [#allocation2]  }
  0x18   : > { %s390_s21 = sshll.u32 %s154_s20, 8  ;;  %s453_s12 = sshll.u32 %s529_s9, 4  ;;  %s454_s12 = int_to_ptr.vmem [resolvable:$false] %s453_s12 }
  0x19   : > { %s602_s24 = scalar_lea.vmem %s691_s0, %s390_s21  ;;  %s455_s13 = scalar_lea.vmem %s454_s12, 2048 }
  0x1a   : > { %v183_v0 = vld [vmem:[%s602_s24 + $0x80] sm:$0xff]  ;;  %v184_v2 = vld [vmem:[%s602_s24 + $0x88] sm:$0xff]  ;;  %v185_v4 = vld [vmem:[%s602_s24 + $0x90] sm:$0xff]  ;;  %p456_p1 = scmp.lt.s32.totalorder %s638_s28, %s454_s12  ;;  %p457_p2 = scmp.lt.s32.totalorder %s455_s13, %s449_s5 }
  0x1b   : > { %v167_v1 = vld [vmem:[%s602_s24] sm:$0xff]  ;;  %231 = vxpose.xlu1.b32.start [1/16] (narrow) %v183_v0, 32  ;;  %v168_v3 = vld [vmem:[%s602_s24 + $0x8] sm:$0xff]  ;;  %v169_v5 = vld [vmem:[%s602_s24 + $0x10] sm:$0xff] }
  0x1c   : > { %199 = vxpose.xlu0.b32.start [1/16] (narrow) %v167_v1, 32  ;;  %v186_v6 = vld [vmem:[%s602_s24 + $0x98] sm:$0xff]  ;;  %v187_v8 = vld [vmem:[%s602_s24 + $0xa0] sm:$0xff]  ;;  %v188_v10 = vld [vmem:[%s602_s24 + $0xa8] sm:$0xff]  ;;  %p458_p3 = por %p457_p2, %p456_p1 }
  0x1d   : > { %v170_v7 = vld [vmem:[%s602_s24 + $0x18] sm:$0xff]  ;;  %v171_v9 = vld [vmem:[%s602_s24 + $0x20] sm:$0xff]  ;;  %v172_v11 = vld [vmem:[%s602_s24 + $0x28] sm:$0xff] }
  0x1e   : > { %v189_v12 = vld [vmem:[%s602_s24 + $0xb0] sm:$0xff]  ;;  %v190_v14 = vld [vmem:[%s602_s24 + $0xb8] sm:$0xff]  ;;  %v191_v16 = vld [vmem:[%s602_s24 + $0xc0] sm:$0xff]  ;;  %p459_p5 = pnand %p458_p3, %p452_p0 }
  0x1f   : > { %232 = vxpose.xlu1.b32.cont [2/16] (narrow) %v184_v2, 32  ;;  %v173_v13 = vld [vmem:[%s602_s24 + $0x30] sm:$0xff]  ;;  %v174_v15 = vld [vmem:[%s602_s24 + $0x38] sm:$0xff]  ;;  %v175_v17 = vld [vmem:[%s602_s24 + $0x40] sm:$0xff] }
  0x20   : > { %200 = vxpose.xlu0.b32.cont [2/16] (narrow) %v168_v3, 32  ;;  %v192_v18 = vld [vmem:[%s602_s24 + $0xc8] sm:$0xff]  ;;  %v193_v20 = vld [vmem:[%s602_s24 + $0xd0] sm:$0xff]  ;;  %v194_v22 = vld [vmem:[%s602_s24 + $0xd8] sm:$0xff] }
  0x21   : > { %v176_v19 = vld [vmem:[%s602_s24 + $0x48] sm:$0xff]  ;;  %v177_v21 = vld [vmem:[%s602_s24 + $0x50] sm:$0xff]  ;;  %v178_v23 = vld [vmem:[%s602_s24 + $0x58] sm:$0xff] }
  0x22   : > { %v195_v24 = vld [vmem:[%s602_s24 + $0xe0] sm:$0xff]  ;;  %v196_v26 = vld [vmem:[%s602_s24 + $0xe8] sm:$0xff]  ;;  %v197_v28 = vld [vmem:[%s602_s24 + $0xf0] sm:$0xff] }
  0x23   : > { %233 = vxpose.xlu1.b32.cont [3/16] (narrow) %v185_v4, 32  ;;  %v179_v25 = vld [vmem:[%s602_s24 + $0x60] sm:$0xff]  ;;  %v180_v27 = vld [vmem:[%s602_s24 + $0x68] sm:$0xff]  ;;  %v181_v29 = vld [vmem:[%s602_s24 + $0x70] sm:$0xff] }
  0x24   : > { %201 = vxpose.xlu0.b32.cont [3/16] (narrow) %v169_v5, 32  ;;  %v198_v30 = vld [vmem:[%s602_s24 + $0xf8] sm:$0xff] }
  0x25   : > { %v182_v31 = vld [vmem:[%s602_s24 + $0x78] sm:$0xff] }
  0x27   : > { %234 = vxpose.xlu1.b32.cont [4/16] (narrow) %v186_v6, 32 }
  0x28   : > { %202 = vxpose.xlu0.b32.cont [4/16] (narrow) %v170_v7, 32 }
  0x2b   : > { %235 = vxpose.xlu1.b32.cont [5/16] (narrow) %v187_v8, 32 }
  0x2c   : > { %203 = vxpose.xlu0.b32.cont [5/16] (narrow) %v171_v9, 32 }
  0x2f   : > { %236 = vxpose.xlu1.b32.cont [6/16] (narrow) %v188_v10, 32 }
  0x30   : > { %204 = vxpose.xlu0.b32.cont [6/16] (narrow) %v172_v11, 32 }
  0x33   : > { %237 = vxpose.xlu1.b32.cont [7/16] (narrow) %v189_v12, 32 }
  0x34   : > { %205 = vxpose.xlu0.b32.cont [7/16] (narrow) %v173_v13, 32 }
  0x37   : > { %238 = vxpose.xlu1.b32.cont [8/16] (narrow) %v190_v14, 32 }
  0x38   : > { %206 = vxpose.xlu0.b32.cont [8/16] (narrow) %v174_v15, 32 }
  0x3b   : > { %239 = vxpose.xlu1.b32.cont [9/16] (narrow) %v191_v16, 32 }
  0x3c   : > { %207 = vxpose.xlu0.b32.cont [9/16] (narrow) %v175_v17, 32 }
  0x3f   : > { %240 = vxpose.xlu1.b32.cont [10/16] (narrow) %v192_v18, 32 }
  0x40   : > { %208 = vxpose.xlu0.b32.cont [10/16] (narrow) %v176_v19, 32 }
  0x43   : > { %241 = vxpose.xlu1.b32.cont [11/16] (narrow) %v193_v20, 32 }
  0x44   : > { %209 = vxpose.xlu0.b32.cont [11/16] (narrow) %v177_v21, 32 }
  0x47   : > { %242 = vxpose.xlu1.b32.cont [12/16] (narrow) %v194_v22, 32 }
  0x48   : > { %210 = vxpose.xlu0.b32.cont [12/16] (narrow) %v178_v23, 32 }
  0x4b   : > { %243 = vxpose.xlu1.b32.cont [13/16] (narrow) %v195_v24, 32 }
  0x4c   : > { %211 = vxpose.xlu0.b32.cont [13/16] (narrow) %v179_v25, 32 }
  0x4f   : > { %244 = vxpose.xlu1.b32.cont [14/16] (narrow) %v196_v26, 32 }
  0x50   : > { %212 = vxpose.xlu0.b32.cont [14/16] (narrow) %v180_v27, 32 }
  0x53   : > { %245 = vxpose.xlu1.b32.cont [15/16] (narrow) %v197_v28, 32 }
  0x54   : > { %213 = vxpose.xlu0.b32.cont [15/16] (narrow) %v181_v29, 32 }
  0x57   : > { %246 = vxpose.xlu1.b32.end [16/16] (narrow) %v198_v30, 32 }
  0x58   : > { %214 = vxpose.xlu0.b32.end [16/16] (narrow) %v182_v31, 32 }
  0x9b   : > { %v247_v32 = vpop.trf.xlu1 }
  0x9c   : > { %v215_v33 = vpop.trf.xlu0  ;;  %264 = vst [vmem:[%s151_s27 + $0x8] sm:$0xff] %v247_v32 }
  0x9d   : > { %263 = vst [vmem:[%s151_s27] sm:$0xff] %v215_v33 }
  0x9f   : > { %v248_v34 = vpop.trf.xlu1 }
  0xa0   : > { %v216_v35 = vpop.trf.xlu0  ;;  %266 = vst [vmem:[%s151_s27 + $0x18] sm:$0xff] %v248_v34 }
  0xa1   : > { %265 = vst [vmem:[%s151_s27 + $0x10] sm:$0xff] %v216_v35 }
  0xa3   : > { %v249_v36 = vpop.trf.xlu1 }
  0xa4   : > { %v217_v37 = vpop.trf.xlu0  ;;  %268 = vst [vmem:[%s151_s27 + $0x28] sm:$0xff] %v249_v36 }
  0xa5   : > { %267 = vst [vmem:[%s151_s27 + $0x20] sm:$0xff] %v217_v37 }
  0xa7   : > { %v250_v38 = vpop.trf.xlu1 }
  0xa8   : > { %v218_v39 = vpop.trf.xlu0  ;;  %270 = vst [vmem:[%s151_s27 + $0x38] sm:$0xff] %v250_v38 }
  0xa9   : > { %269 = vst [vmem:[%s151_s27 + $0x30] sm:$0xff] %v218_v39 }
  0xaa   : > { %462 = shalt.err (!%p459_p5)
}
  0xab   : > { %s463_s15 = scalar_lea.hbm %s643_s3, 1024  ;;  %s467_s21 = scalar_lea.hbm %s692_s1, 2048 }
  0xac   : > { %p464_p6 = scmp.ne.s32.totalorder %s643_s3, %s463_s15  ;;  %p468_p10 = scmp.lt.u32.totalorder %s643_s3, %s692_s1 }
  0xad   : > { %p469_p11 = scmp.lt.u32.totalorder %s467_s21, %s463_s15  ;;  %p471_p13 = scmp.lt.u32.totalorder %s463_s15, %s643_s3 }
  0xae   : > { %p465_p7 = pnand %p464_p6, %p582_p4 }
  0xaf   : > { %p470_p12 = por %p469_p11, %p468_p10 }
  0xb0   : > { %p466_p9 = pneg %p465_p7 }
  0xb1   : > { %p472_p0 = por %p471_p13, %p470_p12 }
  0xb3   : > { %p473_p1 = pnand %p472_p0, %p466_p9 }
  0xb5   : > { %476 = shalt.err (!%p473_p1)
}
  0xb6   : > { %s530_s24 = smov 256   ;;  %s531_s25 = smov 16  }
  0xb7   : > { %392 = dma.vmem_to_hbm [thread:$0]  (%p582_p4), %s638_s28, 1024, %s643_s3, %s645_s4, %s530_s24, %s530_s24, %s531_s25  }
  0xb8 PF: > { %p398_p2 = scmp.ge.s32.totalorder %s527_s11, 2  ;;  %s305_s26 = sand.u32 1, %s507_s6  }
  0xb9   : > { %s306_s27 = scalar_lea.sflag [#allocation3], %s305_s26 }
  0xba   : > { %p395_p3 = pnand %p398_p2, %p589_p8 }
  0xbc   : > { %502 = dma.done.wait (!%p395_p3), %s306_s27, 1024  }
  0xbd   : > { %504 = vsyncadd (!%p395_p3), %s306_s27, 4294966272  ;;  %s14_s11 = sadd.s32 1, %s527_s11   ;;  %s695_s6 = smov %s511_s7 }
  0xbe   : > { %p11_p5 = scmp.ge.s32.totalorder %s14_s11, 4   ;;  %s696_s7 = smov %s515_s8 }
  0xbf   : > { %s697_s8 = smov %s595_s19  ;;  %s698_s9 = smov %s523_s10 }
  0xc0   : > { %s699_s10 = smov %s701_s14  ;;  %13 = sbr.rel (!%p11_p5) target bundleno = 4 (0x4), region = 59 }
  0xc7   :  { %311 = vsyncpa [#allocation3], 1 }
  0xc8   :  { %313 = vsyncpa [#allocation3 + $0x1], 1 }

</bundles_post_ra>
